<compile_context>
chip_gen: v7x
topology: tpu7x:2x2x1
jax: 0.10.0
libtpu: 0.0.40
codegen_flags: <defaults>
</compile_context>

<pallas_src>
import jax
import jax.numpy as jnp
from jax.experimental import pallas as pl
from jax.experimental.pallas import tpu as pltpu

T_STEPS = 29  # hard-coded in the PyTorch forward (range(0, 29))


def _round_up(n, m):
    return ((n + m - 1) // m) * m


def _nll_seq_kernel(tgt_ref, x_ref, out_ref):
    # tgt_ref: (tb, 1) int32 VMEM   -- per-batch-row target, -1 => padded row
    # x_ref:   (tb, t_blk, C) VMEM  -- raw activations, t_blk >= 29
    # out_ref: (1, 8, 128) f32 VMEM -- per-tile partial sum (broadcast-filled)
    x = x_ref[...]
    tb, t_blk, C = x.shape

    # stable log-sum-exp over the class (lane) axis; max is exact in any dtype,
    # upcast only for the shifted values that feed exp / the gather
    m = jnp.max(x, axis=-1, keepdims=True)                              # (tb, t_blk, 1)
    xm = x.astype(jnp.float32) - m.astype(jnp.float32)                  # (tb, t_blk, C)
    lse = jnp.log(jnp.sum(jnp.exp(xm), axis=-1, keepdims=True))         # (tb, t_blk, 1)

    # one-hot built once per batch row, broadcast over the time axis
    tgt = tgt_ref[...].reshape(tb, 1, 1)                                # (tb, 1, 1)
    class_ids = jax.lax.broadcasted_iota(jnp.int32, (tb, 1, C), 2)
    onehot = class_ids == tgt                                           # (tb, 1, C)
    xm_tgt = jnp.sum(jnp.where(onehot, xm, 0.0),
                     axis=-1, keepdims=True)                            # (tb, t_blk, 1)

    # -logp[b, t, tgt[b]] = lse - (x - m)[tgt]
    nll = lse - xm_tgt                                                  # (tb, t_blk, 1)

    # mask out timesteps >= 29 and padded batch rows (target == -1)
    t_ids = jax.lax.broadcasted_iota(jnp.int32, (tb, t_blk, 1), 1)
    valid = (t_ids < T_STEPS) & (tgt >= 0)                              # (tb, t_blk, 1)
    partial = jnp.sum(jnp.where(valid, nll, 0.0))                       # scalar

    # simple unmasked broadcast store; the wrapper reads element [i, 0, 0]
    out_ref[...] = jnp.full(out_ref.shape, partial, dtype=out_ref.dtype)


def nll_sequence_loss(x, target, *, vmem_block_bytes=2 << 20):
    """x: (B, T, C) float32/bf16, target: (B,) int -> scalar float32 loss."""
    B, T, C = x.shape
    assert T >= T_STEPS, "module sums over the first 29 timesteps"

    # time block covering t = 0..28: 32 keeps sublane divisibility when T >= 32,
    # otherwise the full (ragged) time extent is also a legal block dim.
    t_blk = 32 if T >= 32 else T

    # batch tile from a VMEM budget (~2 MiB per x buffer, double-buffered).
    itemsize = jnp.dtype(x.dtype).itemsize
    bytes_per_batch_row = t_blk * C * itemsize
    tb = max(1, vmem_block_bytes // bytes_per_batch_row)
    if tb >= B:
        tb, b_pad = B, B                       # single tile: (tb, 1) == full dims
    else:
        tb = max(8, (tb // 8) * 8)             # multiple of 8 -> legal (tb, 1) block
        b_pad = _round_up(B, tb)
    num_tiles = b_pad // tb
    # TODO(synk): for very large C a class-tiled variant is needed (tb=8 block
    # could exceed VMEM); fine for typical lipreading vocab sizes.

    tgt = target.astype(jnp.int32).reshape(B, 1)
    if b_pad != B:
        # only the tiny (B, 1) target array is padded; x is tiled in place and
        # out-of-range batch rows are masked in-kernel via target == -1.
        tgt = jnp.pad(tgt, ((0, b_pad - B), (0, 0)), constant_values=-1)

    partials = pl.pallas_call(
        _nll_seq_kernel,
        out_shape=jax.ShapeDtypeStruct((num_tiles, 8, 128), jnp.float32),
        grid=(num_tiles,),
        in_specs=[
            pl.BlockSpec((tb, 1), lambda i: (i, 0)),          # per-batch targets
            pl.BlockSpec((tb, t_blk, C), lambda i: (i, 0, 0)),  # raw activations
        ],
        out_specs=pl.BlockSpec((1, 8, 128), lambda i: (i, 0, 0)),
        compiler_params=pltpu.CompilerParams(
            dimension_semantics=("parallel",),   # shard batch tiles across TCs (v7x)
            vmem_limit_bytes=32 << 20),          # fits v5e/v6e scoped + v7x physical
    )(tgt, x)

    # tiny final reduction of the per-tile partials in the wrapper
    return jnp.sum(partials[:, 0, 0]) / jnp.float32(B)


def _reference_loss(x, target):
    # pure-JAX reference mirroring the PyTorch module
    logp = jax.nn.log_softmax(x.astype(jnp.float32), axis=2)            # (B, T, C)
    gathered = jnp.take_along_axis(
        logp, target[:, None, None].astype(jnp.int32), axis=2
    )[:, :T_STEPS, 0]                                                   # (B, 29)
    return jnp.sum(jnp.mean(-gathered, axis=0))


if __name__ == "__main__":
    key = jax.random.PRNGKey(0)
    kx, kt = jax.random.split(key)

    # small shapes consistent with the module: batch=4, seq=32 (>29), classes=32
    B, T, C = 4, 32, 32
    x = jax.random.normal(kx, (B, T, C), dtype=jnp.float32)
    target = jax.random.randint(kt, (B,), 0, C, dtype=jnp.int32)

    loss = nll_sequence_loss(x, target)
    jax.block_until_ready(loss)

    ref = _reference_loss(x, target)
    assert jnp.allclose(loss, ref, rtol=1e-5, atol=1e-5), (loss, ref)

    print("KERNEL_OK")
</pallas_src>

<mosaic_0001>
module attributes {stable_mosaic.version = 11 : i64} {
  func.func @_nll_seq_kernel(%arg0: i32, %arg1: memref<4x1xi32, #tpu.memory_space<vmem>>, %arg2: memref<4x32x32xf32, #tpu.memory_space<vmem>>, %arg3: memref<1x8x128xf32, #tpu.memory_space<vmem>>) attributes {dimension_semantics = [#tpu.dimension_semantics<parallel>], iteration_bounds = array<i64: 1>, scalar_prefetch = 0 : i64, scratch_operands = 0 : i64, tpu.core_type = #tpu.core_type<tc>, window_params = [{transform_indices = @transform_0, window_bounds = array<i64: 4, 1>}, {transform_indices = @transform_1, window_bounds = array<i64: 4, 32, 32>}, {transform_indices = @transform_2, window_bounds = array<i64: 1, 8, 128>}]} {
    %c0 = arith.constant 0 : index
    %c0_0 = arith.constant 0 : index
    %c0_1 = arith.constant 0 : index
    %0 = vector.load %arg2[%c0, %c0_0, %c0_1] : memref<4x32x32xf32, #tpu.memory_space<vmem>>, vector<4x32x32xf32>
    %cst = arith.constant dense<0xFF800000> : vector<4x32xf32>
    %1 = vector.multi_reduction <maximumf>, %0, %cst [2] : vector<4x32x32xf32> to vector<4x32xf32>
    %2 = vector.shape_cast %1 : vector<4x32xf32> to vector<4x32x1xf32>
    %3 = vector.broadcast %2 : vector<4x32x1xf32> to vector<4x32x32xf32>
    %4 = arith.subf %0, %3 : vector<4x32x32xf32>
    %5 = math.exp %4 : vector<4x32x32xf32>
    %cst_2 = arith.constant dense<0.000000e+00> : vector<4x32xf32>
    %6 = vector.multi_reduction <add>, %5, %cst_2 [2] : vector<4x32x32xf32> to vector<4x32xf32>
    %7 = vector.shape_cast %6 : vector<4x32xf32> to vector<4x32x1xf32>
    %8 = math.log %7 : vector<4x32x1xf32>
    %c0_3 = arith.constant 0 : index
    %c0_4 = arith.constant 0 : index
    %9 = vector.load %arg1[%c0_3, %c0_4] : memref<4x1xi32, #tpu.memory_space<vmem>>, vector<4x1xi32>
    %10 = vector.shape_cast %9 : vector<4x1xi32> to vector<4x1x1xi32>
    %11 = tpu.iota {dimensions = array<i32: 2>} : vector<4x1x32xi32>
    %12 = vector.broadcast %10 : vector<4x1x1xi32> to vector<4x1x32xi32>
    %13 = arith.cmpi eq, %11, %12 : vector<4x1x32xi32>
    %cst_5 = arith.constant 0.000000e+00 : f32
    %14 = vector.shape_cast %13 : vector<4x1x32xi1> to vector<4x1x32xi1>
    %15 = vector.broadcast %14 : vector<4x1x32xi1> to vector<4x32x32xi1>
    %16 = vector.broadcast %cst_5 : f32 to vector<4x32x32xf32>
    %17 = arith.select %15, %4, %16 : vector<4x32x32xi1>, vector<4x32x32xf32>
    %cst_6 = arith.constant dense<0.000000e+00> : vector<4x32xf32>
    %18 = vector.multi_reduction <add>, %17, %cst_6 [2] : vector<4x32x32xf32> to vector<4x32xf32>
    %19 = vector.shape_cast %18 : vector<4x32xf32> to vector<4x32x1xf32>
    %20 = arith.subf %8, %19 : vector<4x32x1xf32>
    %21 = tpu.iota {dimensions = array<i32: 1>} : vector<4x32x1xi32>
    %c29_i32 = arith.constant 29 : i32
    %22 = vector.broadcast %c29_i32 : i32 to vector<4x32x1xi32>
    %23 = arith.cmpi slt, %21, %22 : vector<4x32x1xi32>
    %c0_i32 = arith.constant 0 : i32
    %24 = vector.broadcast %c0_i32 : i32 to vector<4x1x1xi32>
    %25 = arith.cmpi sge, %10, %24 : vector<4x1x1xi32>
    %26 = vector.broadcast %25 : vector<4x1x1xi1> to vector<4x32x1xi1>
    %27 = arith.andi %23, %26 : vector<4x32x1xi1>
    %cst_7 = arith.constant 0.000000e+00 : f32
    %28 = vector.broadcast %cst_7 : f32 to vector<4x32x1xf32>
    %29 = arith.select %27, %20, %28 : vector<4x32x1xi1>, vector<4x32x1xf32>
    %30 = vector.shape_cast %29 : vector<4x32x1xf32> to vector<1x4x32x1xf32>
    %cst_8 = arith.constant dense<0.000000e+00> : vector<1xf32>
    %31 = vector.multi_reduction <add>, %30, %cst_8 [1, 2, 3] : vector<1x4x32x1xf32> to vector<1xf32>
    %32 = vector.shape_cast %31 : vector<1xf32> to vector<1x1x1x1xf32>
    %33 = vector.extract %32[0, 0, 0, 0] : f32 from vector<1x1x1x1xf32>
    %34 = vector.broadcast %33 : f32 to vector<1x8x128xf32>
    %c0_9 = arith.constant 0 : index
    %c0_10 = arith.constant 0 : index
    %c0_11 = arith.constant 0 : index
    %35 = vector.load %arg3[%c0_9, %c0_10, %c0_11] : memref<1x8x128xf32, #tpu.memory_space<vmem>>, vector<1x8x128xf32>
    tpu.vector_store %arg3[%c0_9, %c0_10, %c0_11], %34 {strides = array<i32>} : memref<1x8x128xf32, #tpu.memory_space<vmem>>, vector<1x8x128xf32>,
    return
  }
  func.func @transform_0(%arg0: i32) -> (i32, i32) {
    %c0_i32 = arith.constant 0 : i32
    %c0_i32_0 = arith.constant 0 : i32
    return %arg0, %c0_i32 : i32, i32
  }
  func.func @transform_1(%arg0: i32) -> (i32, i32, i32) {
    %c0_i32 = arith.constant 0 : i32
    %c0_i32_0 = arith.constant 0 : i32
    %c0_i32_1 = arith.constant 0 : i32
    return %arg0, %c0_i32, %c0_i32_0 : i32, i32, i32
  }
  func.func @transform_2(%arg0: i32) -> (i32, i32, i32) {
    %c0_i32 = arith.constant 0 : i32
    %c0_i32_0 = arith.constant 0 : i32
    %c0_i32_1 = arith.constant 0 : i32
    return %arg0, %c0_i32, %c0_i32_0 : i32, i32, i32
  }
}

</mosaic_0001>

<bundles_post_ra>
// kernel: tpu_custom_call.1
= control target key start
LH: loop header
LB: loop body
LE: loop exit
PB: predicated region body
PF: predicated region fallthrough
CT: control target
= control target key end

     0   :  { %7 = vsyncpa [#allocation3], 0  ;;  %s988_s0 = inlined_call_operand.vmem [shape: s32[4,1], index: 0, kind: input, shape index: {}]   ;;  %s989_s1 = inlined_call_operand.hbm [shape: f32[4,32,32], index: 1, kind: input, shape index: {}]   ;;  %s990_s2 = inlined_call_operand.hbm [shape: f32[1,8,128], index: 2, kind: output, shape index: {}]  }
   0x1   :  { %8 = vsyncpa [#allocation4], 0  ;;  %s616_s9 = smov [#allocation2]   ;;  %s568_s13 = scalar_lea.hbm %s989_s1, 2048 }
   0x2   :  { %s16_s10 = sshll.u32 %s616_s9, 4  ;;  %p569_p0 = scmp.ne.s32.totalorder %s989_s1, %s568_s13  ;;  %s17_s10 = int_to_ptr.vmem [resolvable:$true] %s16_s10 }
   0x3   :  { %p572_p1 = scmp.lt.u32.totalorder %s568_s13, %s989_s1 }
   0x5   :  { %p574_p2 = pnand %p572_p1, %p569_p0 }
   0x7   :  { %577 = shalt.err (!%p574_p2)
}
   0x8   :  { %s578_s18 = scalar_lea.vmem %s17_s10, 2048  ;;  %p583_p4 = scmp.lt.s32.totalorder %s17_s10, %s17_s10 }
   0x9   :  { %p579_p3 = scmp.ne.s32.totalorder %s17_s10, %s578_s18  ;;  %p584_p5 = scmp.lt.s32.totalorder %s578_s18, %s578_s18 }
   0xb   :  { %p585_p6 = por %p584_p5, %p583_p4 }
   0xd   :  { %p586_p7 = pnand %p585_p6, %p579_p3 }
   0xf   :  { %589 = shalt.err (!%p586_p7)
}
  0x10   :  { %s617_s19 = smov 128   ;;  %s618_s20 = smov 8  }
  0x11   :  { %22 = dma.hbm_to_vmem [thread:$0]  %s989_s1, 2048, %s17_s10, [#allocation3], %s617_s19, %s617_s19, %s618_s20  }
  0x12   :  { %612 = dma.done.wait [#allocation3], 2048  }
  0x13   :  { %613 = vsyncadd [#allocation3], 4294965248  ;;  %v619_v0 = vmov 0   ;;  %vm42_vm0 = vcmask 261120   ;;  %v651_v1 = vld [vmem:[#allocation2 + $0x10] sm:$0xff]  ;;  %v653_v2 = vld [vmem:[#allocation2] sm:$0xff]  ;;  %v231_v35 = vlaneseq }
  0x14   :  { %503 = vset.pattern.permute.xlu1 %v619_v0  ;;  %502 = vset.pattern.permute.xlu0 %v619_v0  ;;  %v655_v3 = vld [vmem:[#allocation2 + $0x18] sm:$0xff]  ;;  %v49_v4 = vsel %vm42_vm0, %v651_v1, -inf  ;;  %v43_v5 = vsel %vm42_vm0, %v653_v2, -inf  ;;  %v661_v6 = vld [vmem:[#allocation2 + $0x8] sm:$0xff]  ;;  %v669_v10 = vld [vmem:[#allocation2 + $0x20] sm:$0xff]  ;;  %vm435_vm9 = vcmask 7168  }
  0x15   :  { %50 = vmax.xlane.f32.xlu1 %v49_v4  ;;  %44 = vmax.xlane.f32.xlu0 %v43_v5  ;;  %v52_v7 = vsel %vm42_vm0, %v655_v3, -inf  ;;  %v46_v8 = vsel %vm42_vm0, %v661_v6, -inf  ;;  %v667_v9 = vld [vmem:[#allocation2 + $0x28] sm:$0xff]  ;;  %v55_v12 = vsel %vm42_vm0, %v669_v10, -inf  ;;  %v675_v13 = vld [vmem:[#allocation2 + $0x38] sm:$0xff]  ;;  %v32_v14 = vld [vmem:[#allocation2 + $0x30] sm:$0xff] }
  0x16   :  { %v58_v11 = vsel %vm42_vm0, %v667_v9, -inf  ;;  %v64_v15 = vsel %vm42_vm0, %v675_v13, -inf  ;;  %v61_v16 = vsel %vm42_vm0, %v32_v14, -inf  ;;  %v680_v17 = vld [vmem:[#allocation2 + $0x48] sm:$0xff]  ;;  %v34_v18 = vld [vmem:[#allocation2 + $0x40] sm:$0xff]  ;;  %v685_v21 = vld [vmem:[#allocation2 + $0x58] sm:$0xff] }
  0x17   :  { %v70_v19 = vsel %vm42_vm0, %v680_v17, -inf  ;;  %v67_v20 = vsel %vm42_vm0, %v34_v18, -inf  ;;  %v687_v22 = vld [vmem:[#allocation2 + $0x50] sm:$0xff]  ;;  %v76_v23 = vsel %vm42_vm0, %v685_v21, -inf  ;;  %v693_v25 = vld [vmem:[#allocation2 + $0x68] sm:$0xff]  ;;  %v695_v26 = vld [vmem:[#allocation2 + $0x60] sm:$0xff] }
  0x18   :  { %v73_v24 = vsel %vm42_vm0, %v687_v22, -inf  ;;  %v82_v27 = vsel %vm42_vm0, %v693_v25, -inf  ;;  %v79_v28 = vsel %vm42_vm0, %v695_v26, -inf  ;;  %v701_v29 = vld [vmem:[#allocation2 + $0x78] sm:$0xff]  ;;  %v703_v30 = vld [vmem:[#allocation2 + $0x70] sm:$0xff]  ;;  %v709_v37 = vshrl.u32 %v231_v35, 7 }
  0x19   :  { %53 = vmax.xlane.f32.xlu1 %v52_v7  ;;  %47 = vmax.xlane.f32.xlu0 %v46_v8  ;;  %v88_v31 = vsel %vm42_vm0, %v701_v29, -inf  ;;  %v85_v32 = vsel %vm42_vm0, %v703_v30, -inf  ;;  %v620_v33 = vmov 1966171168  }
  0x1a   :  { %v229_v34 = vunpack.c.l.s4 %v620_v33  ;;  %v493_v38 = vld.sshfl [vmem:[%s988_s0] sm:$0x33 pattern:$0x75316420]  ;;  %v746_v7 = vsub.s32 0, %v709_v37  ;;  %s621_s0 = smov [#allocation5]  }
  0x1b   :  { %v227_v39 = vcombine.high %v493_v38, %v493_v38  ;;  %s484_s24 = sshll.u32 %s621_s0, 4  ;;  %s485_s24 = int_to_ptr.vmem [resolvable:$true] %s484_s24 }
  0x1c   :  { %v230_v36 = vunpack.c.0.s8 %v229_v34  ;;  %s590_s26 = scalar_lea.vmem %s485_s24, 128  ;;  %p595_p9 = scmp.lt.s32.totalorder %s485_s24, %s485_s24 }
  0x1d   :  { %59 = vmax.xlane.f32.xlu1 %v58_v11  ;;  %56 = vmax.xlane.f32.xlu0 %v55_v12  ;;  %p591_p8 = scmp.ne.s32.totalorder %s485_s24, %s590_s26  ;;  %p596_p10 = scmp.lt.s32.totalorder %s590_s26, %s590_s26 }
  0x1e   :  { %v233_v40 = vsub.s32 %v230_v36, %v709_v37 }
  0x1f   :  { %p597_p11 = por %p596_p10, %p595_p9 }
  0x20   :  { %v715_v41 = vrot.slane %v493_v38, %v233_v40  ;;  %v717_v42 = vrot.slane %v227_v39, %v233_v40 }
  0x21   :  { %65 = vmax.xlane.f32.xlu1 %v64_v15  ;;  %62 = vmax.xlane.f32.xlu0 %v61_v16  ;;  %p598_p12 = pnand %p597_p11, %p591_p8 }
  0x22   :  { %v722_v43 = vcombine.high %v715_v41, %v715_v41  ;;  %v727_v44 = vcombine.high %v717_v42, %v717_v42  ;;  %vm375_vm5 = vcmp.ge.s32.totalorder %v715_v41, 0  ;;  %vm376_vm6 = vcmp.ge.s32.totalorder %v717_v42, 0 }
  0x24   :  { %vm377_vm12 = vcmp.ge.s32.totalorder %v722_v43, 0  ;;  %vm378_vm14 = vcmp.ge.s32.totalorder %v727_v44, 0 }
  0x25   :  { %71 = vmax.xlane.f32.xlu1 %v70_v19  ;;  %68 = vmax.xlane.f32.xlu0 %v67_v20 }
  0x29   :  { %77 = vmax.xlane.f32.xlu1 %v76_v23  ;;  %74 = vmax.xlane.f32.xlu0 %v73_v24 }
  0x2d   :  { %83 = vmax.xlane.f32.xlu1 %v82_v27  ;;  %80 = vmax.xlane.f32.xlu0 %v79_v28 }
  0x31   :  { %89 = vmax.xlane.f32.xlu1 %v88_v31  ;;  %86 = vmax.xlane.f32.xlu0 %v85_v32 }
  0x42   :  { %254 = vperm.xlu1 %503, %v717_v42  }
  0x46   :  { %261 = vperm.xlu1 %503, %v722_v43  }
  0x47   :  { %247 = vperm.xlu0 %502, %v715_v41  }
  0x4a   :  { %268 = vperm.xlu1 %503, %v727_v44  }
  0xa2   :  { %v51_v45 = vpop.xlane.xlu1 %50  ;;  %v45_v46 = vpop.xlane.xlu0 %44 }
  0xa3   :  { %v91_v8 = vsub.f32 %v653_v2, %v45_v46  ;;  %v93_v16 = vsub.f32 %v651_v1, %v51_v45 }
  0xa5   :  { %v111_v32 = vmul.f32 1.442695, %v93_v16 }
  0xa6   :  { %v54_v47 = vpop.xlane.xlu1 %53  ;;  %v48_v48 = vpop.xlane.xlu0 %47 }
  0xa7   :  { %v92_v57 = vsub.f32 %v661_v6, %v48_v48 }
  0xa9   :  { %v109_v59 = vmul.f32 1.442695, %v92_v57 }
  0xaa   :  { %v731_v49 = vpop.xlane.xlu1 %59  ;;  %v57_v50 = vpop.xlane.xlu0 %56 }
  0xab   :  { %504 = vpow2.f32 %v109_v59  ;;  %v95_v45 = vsub.f32 %v669_v10, %v57_v50  ;;  %v800_v50 = vsub.f32 %v667_v9, %v731_v49 }
  0xae   :  { %v733_v51 = vpop.xlane.xlu1 %65  ;;  %v63_v52 = vpop.xlane.xlu0 %62 }
  0xaf   :  { %v736_v60 = vsub.f32 %v32_v14, %v63_v52  ;;  %v753_v14 = vand.u32 127, %v231_v35  ;;  %v811_v9 = vsub.f32 %v675_v13, %v733_v51 }
  0xb1   :  { %v119_v62 = vmul.f32 1.442695, %v736_v60 }
  0xb2   :  { %v72_v53 = vpop.xlane.xlu1 %71  ;;  %v69_v54 = vpop.xlane.xlu0 %68 }
  0xb3   :  { %v739_v63 = vsub.f32 %v34_v18, %v69_v54  ;;  %v750_v6 = vsub.f32 %v680_v17, %v72_v53  ;;  %506 = vpow2.f32 %v119_v62  ;;  %v107_v18 = vmul.f32 1.442695, %v91_v8 }
  0xb4   :  { %v115_v54 = vmul.f32 1.442695, %v95_v45  ;;  %v117_v62 = vmul.f32 1.442695, %v800_v50 }
  0xb5   :  { %v123_v11 = vmul.f32 1.442695, %v739_v63  ;;  %v125_v19 = vmul.f32 1.442695, %v750_v6  ;;  %v505_v28 = vpop.eup %504 }
  0xb6   :  { %v75_v55 = vpop.xlane.xlu0 %74  ;;  %v78_v56 = vpop.xlane.xlu1 %77  ;;  %v142_v38 = vsel %vm42_vm0, %v505_v28, 0.0 }
  0xb7   :  { %508 = vpow2.f32 %v123_v11  ;;  %v764_v2 = vsub.f32 %v687_v22, %v75_v55  ;;  %v94_v22 = vsub.f32 %v655_v3, %v54_v47  ;;  %v777_v34 = vsub.f32 %v685_v21, %v78_v56 }
  0xb8   :  { %510 = vpow2.f32 %v107_v18 }
  0xb9   :  { %512 = vpow2.f32 %v125_v19  ;;  %v127_v35 = vmul.f32 1.442695, %v764_v2  ;;  %v113_v3 = vmul.f32 1.442695, %v94_v22  ;;  %v129_v46 = vmul.f32 1.442695, %v777_v34 }
  0xba   :  { %v81_v58 = vpop.xlane.xlu0 %80  ;;  %v84_v61 = vpop.xlane.xlu1 %83  ;;  %514 = vpow2.f32 %v111_v32 }
  0xbb   :  { %516 = vpow2.f32 %v127_v35  ;;  %v792_v47 = vsub.f32 %v695_v26, %v81_v58  ;;  %v803_v26 = vsub.f32 %v693_v25, %v84_v61 }
  0xbc   :  { %518 = vpow2.f32 %v113_v3 }
  0xbd   :  { %v507_v39 = vpop.eup %506  ;;  %520 = vpow2.f32 %v129_v46  ;;  %v131_v55 = vmul.f32 1.442695, %v792_v47  ;;  %v133_v25 = vmul.f32 1.442695, %v803_v26 }
  0xbe   :  { %v741_v4 = vpop.xlane.xlu0 %86  ;;  %v743_v5 = vpop.xlane.xlu1 %89  ;;  %v157_v52 = vsel %vm42_vm0, %v507_v39, 0.0  ;;  %522 = vpow2.f32 %v115_v54 }
  0xbf   :  { %524 = vpow2.f32 %v131_v55  ;;  %v816_v49 = vsub.f32 %v703_v30, %v741_v4  ;;  %v823_v13 = vsub.f32 %v701_v29, %v743_v5 }
  0xc0   :  { %526 = vpow2.f32 %v117_v62 }
  0xc1   :  { %v509_v53 = vpop.eup %508  ;;  %528 = vpow2.f32 %v133_v25  ;;  %v135_v51 = vmul.f32 1.442695, %v816_v49  ;;  %v137_v19 = vmul.f32 1.442695, %v823_v13 }
  0xc2   :  { %v255_v17 = vpop.permute.xlu1 %254  ;;  %v511_v56 = vpop.eup %510  ;;  %v163_v58 = vsel %vm42_vm0, %v509_v53, 0.0 }
  0xc3   :  { %v259_v33 = vrot.slane %v255_v17, %v746_v7  ;;  %v513_v59 = vpop.eup %512 }
  0xc4   :  { %v515_v61 = vpop.eup %514  ;;  %v166_v11 = vsel %vm42_vm0, %v513_v59, 0.0 }
  0xc5   :  { %vm786_vm2 = vcmp.eq.s32.totalorder %v753_v14, %v259_v33  ;;  %v145_v4 = vsel %vm42_vm0, %v515_v61, 0.0 }
  0xc6   :  { %v248_v12 = vpop.permute.xlu0 %247  ;;  %v290_v10 = vsel %vm786_vm2, %v95_v45, 0.0  ;;  %v262_v28 = vpop.permute.xlu1 %261  ;;  %v291_v3 = vsel %vm786_vm2, %v800_v50, 0.0  ;;  %v292_v53 = vsel %vm786_vm2, %v736_v60, 0.0 }
  0xc7   :  { %v252_v15 = vrot.slane %v248_v12, %v746_v7  ;;  %v517_v12 = vpop.eup %516  ;;  %v266_v35 = vrot.slane %v262_v28, %v746_v7  ;;  %v320_v54 = vsel %vm42_vm0, %v292_v53, 0.0 }
  0xc8   :  { %v519_v30 = vpop.eup %518 }
  0xc9   :  { %vm759_vm1 = vcmp.eq.s32.totalorder %v753_v14, %v252_v15  ;;  %v121_v15 = vmul.f32 1.442695, %v811_v9  ;;  %v521_v18 = vpop.eup %520  ;;  %v148_v17 = vsel %vm42_vm0, %v519_v30, 0.0  ;;  %vm842_vm3 = vcmp.eq.s32.totalorder %v753_v14, %v266_v35 }
  0xca   :  { %v287_v23 = vsel %vm759_vm1, %v92_v57, 0.0  ;;  %v286_v24 = vsel %vm759_vm1, %v91_v8, 0.0  ;;  %v288_v31 = vsel %vm759_vm1, %v93_v16, 0.0  ;;  %v289_v40 = vsel %vm759_vm1, %v94_v22, 0.0  ;;  %v523_v20 = vpop.eup %522 }
  0xcb   :  { %v305_v1 = vsel %vm42_vm0, %v287_v23, 0.0  ;;  %v302_v27 = vsel %vm42_vm0, %v286_v24, 0.0  ;;  %v308_v36 = vsel %vm42_vm0, %v288_v31, 0.0  ;;  %v311_v48 = vsel %vm42_vm0, %v289_v40, 0.0  ;;  %v525_v5 = vpop.eup %524 }
  0xcc   :  { %306 = vadd.xlane.f32.xlu1 %v305_v1  ;;  %303 = vadd.xlane.f32.xlu0 %v302_v27  ;;  %v314_v57 = vsel %vm42_vm0, %v290_v10, 0.0  ;;  %v139_v8 = vsel %vm42_vm0, %v511_v56, 0.0  ;;  %v169_v16 = vsel %vm42_vm0, %v517_v12, 0.0  ;;  %530 = vpow2.f32 %v121_v15  ;;  %v527_v23 = vpop.eup %526 }
  0xcd   :  { %532 = vpow2.f32 %v135_v51  ;;  %v172_v29 = vsel %vm42_vm0, %v521_v18, 0.0  ;;  %v151_v24 = vsel %vm42_vm0, %v523_v20, 0.0  ;;  %v175_v1 = vsel %vm42_vm0, %v525_v5, 0.0  ;;  %v529_v27 = vpop.eup %528 }
  0xce   :  { %534 = vpow2.f32 %v137_v19  ;;  %v154_v32 = vsel %vm42_vm0, %v527_v23, 0.0  ;;  %v178_v22 = vsel %vm42_vm0, %v529_v27, 0.0  ;;  %v296_v10 = vsel %vm842_vm3, %v764_v2, 0.0 }
  0xcf   :  { %v332_v55 = vsel %vm42_vm0, %v296_v10, 0.0  ;;  %v293_v56 = vsel %vm786_vm2, %v811_v9, 0.0 }
  0xd0   :  { %309 = vadd.xlane.f32.xlu1 %v308_v36  ;;  %143 = vadd.xlane.f32.xlu0 %v142_v38  ;;  %v269_v36 = vpop.permute.xlu1 %268  ;;  %v323_v2 = vsel %vm42_vm0, %v293_v56, 0.0 }
  0xd1   :  { %v273_v46 = vrot.slane %v269_v36, %v746_v7 }
  0xd3   :  { %vm856_vm4 = vcmp.eq.s32.totalorder %v753_v14, %v273_v46 }
  0xd4   :  { %312 = vadd.xlane.f32.xlu1 %v311_v48  ;;  %158 = vadd.xlane.f32.xlu0 %v157_v52  ;;  %v317_v48 = vsel %vm42_vm0, %v291_v3, 0.0  ;;  %v298_v60 = vsel %vm856_vm4, %v792_v47, 0.0  ;;  %v295_v47 = vsel %vm842_vm3, %v750_v6, 0.0  ;;  %v299_v25 = vsel %vm856_vm4, %v803_v26, 0.0 }
  0xd5   :  { %v338_v14 = vsel %vm42_vm0, %v298_v60, 0.0  ;;  %v329_v62 = vsel %vm42_vm0, %v295_v47, 0.0  ;;  %v301_v6 = vsel %vm856_vm4, %v823_v13, 0.0 }
  0xd6   :  { %v531_v31 = vpop.eup %530  ;;  %v347_v61 = vsel %vm42_vm0, %v301_v6, 0.0 }
  0xd7   :  { %v533_v33 = vpop.eup %532  ;;  %v160_v38 = vsel %vm42_vm0, %v531_v31, 0.0 }
  0xd8   :  { %315 = vadd.xlane.f32.xlu1 %v314_v57  ;;  %164 = vadd.xlane.f32.xlu0 %v163_v58  ;;  %v181_v39 = vsel %vm42_vm0, %v533_v33, 0.0  ;;  %v535_v40 = vpop.eup %534  ;;  %v294_v57 = vsel %vm842_vm3, %v739_v63, 0.0  ;;  %v300_v58 = vsel %vm856_vm4, %v816_v49, 0.0  ;;  %v297_v63 = vsel %vm842_vm3, %v777_v34, 0.0 }
  0xd9   :  { %v184_v52 = vsel %vm42_vm0, %v535_v40, 0.0  ;;  %v326_v21 = vsel %vm42_vm0, %v294_v57, 0.0  ;;  %v344_v59 = vsel %vm42_vm0, %v300_v58, 0.0  ;;  %v335_v9 = vsel %vm42_vm0, %v297_v63, 0.0 }
  0xda   :  { %v341_v49 = vsel %vm42_vm0, %v299_v25, 0.0  ;;  %v380_v40 = vsel %vm376_vm6, 1, %v619_v0 }
  0xdb   :  { %v390_v53 = vrot.slane %v380_v40, %v746_v7 }
  0xdc   :  { %140 = vadd.xlane.f32.xlu1 %v139_v8  ;;  %167 = vadd.xlane.f32.xlu0 %v166_v11 }
  0xdd   :  { %vm914_vm11 = vcmp.eq.s32.totalorder %v390_v53, 1 }
  0xe0   :  { %146 = vadd.xlane.f32.xlu1 %v145_v4  ;;  %170 = vadd.xlane.f32.xlu0 %v169_v16 }
  0xe4   :  { %149 = vadd.xlane.f32.xlu1 %v148_v17  ;;  %173 = vadd.xlane.f32.xlu0 %v172_v29  ;;  %v379_v29 = vsel %vm375_vm5, 1, %v619_v0 }
  0xe5   :  { %v386_v28 = vrot.slane %v379_v29, %v746_v7 }
  0xe7   :  { %vm399_vm7 = vcmp.eq.s32.totalorder %v386_v28, 1 }
  0xe8   :  { %152 = vadd.xlane.f32.xlu1 %v151_v24  ;;  %176 = vadd.xlane.f32.xlu0 %v175_v1 }
  0xec   :  { %155 = vadd.xlane.f32.xlu1 %v154_v32  ;;  %179 = vadd.xlane.f32.xlu0 %v178_v22  ;;  %v902_v32 = vadd.s32 24, %v709_v37 }
  0xee   :  { %vm374_vm8 = vcmp.lt.s32.totalorder %v902_v32, 29 }
  0xef   :  { %vm406_vm10 = vmand %vm374_vm8, %vm399_vm7 }
  0xf0   :  { %161 = vadd.xlane.f32.xlu1 %v160_v38  ;;  %182 = vadd.xlane.f32.xlu0 %v181_v39  ;;  %vm410_vm13 = vmand %vm374_vm8, %vm914_vm11 }
  0xf4   :  { %318 = vadd.xlane.f32.xlu1 %v317_v48  ;;  %185 = vadd.xlane.f32.xlu0 %v184_v52 }
  0xf8   :  { %321 = vadd.xlane.f32.xlu1 %v320_v54  ;;  %333 = vadd.xlane.f32.xlu0 %v332_v55 }
  0xfc   :  { %324 = vadd.xlane.f32.xlu1 %v323_v2  ;;  %339 = vadd.xlane.f32.xlu0 %v338_v14 }
 0x100   :  { %327 = vadd.xlane.f32.xlu1 %v326_v21  ;;  %345 = vadd.xlane.f32.xlu0 %v344_v59 }
 0x104   :  { %330 = vadd.xlane.f32.xlu1 %v329_v62 }
 0x108   :  { %336 = vadd.xlane.f32.xlu1 %v335_v9 }
 0x10c   :  { %342 = vadd.xlane.f32.xlu1 %v341_v49 }
 0x110   :  { %348 = vadd.xlane.f32.xlu1 %v347_v61 }
 0x159   :  { %v307_v8 = vpop.xlane.xlu1 %306  ;;  %v304_v11 = vpop.xlane.xlu0 %303 }
 0x15d   :  { %v310_v34 = vpop.xlane.xlu1 %309  ;;  %v144_v12 = vpop.xlane.xlu0 %143 }
 0x15e   :  { %536 = vlog2.f32 %v144_v12 }
 0x161   :  { %v313_v15 = vpop.xlane.xlu1 %312  ;;  %v159_v51 = vpop.xlane.xlu0 %158 }
 0x165   :  { %v894_v30 = vpop.xlane.xlu1 %315  ;;  %v165_v4 = vpop.xlane.xlu0 %164 }
 0x168   :  { %v537_v17 = vpop.eup %536 }
 0x169   :  { %v141_v26 = vpop.xlane.xlu1 %140  ;;  %v168_v16 = vpop.xlane.xlu0 %167  ;;  %v190_v23 = vmul.f32 0.6931472, %v537_v17 }
 0x16a   :  { %538 = vlog2.f32 %v141_v26 }
 0x16b   :  { %v351_v22 = vsub.f32 %v190_v23, %v307_v8 }
 0x16d   :  { %v147_v18 = vpop.xlane.xlu1 %146  ;;  %v171_v19 = vpop.xlane.xlu0 %170  ;;  %v420_v45 = vsel %vm399_vm7, %v351_v22, 0.0 }
 0x16e   :  { %540 = vlog2.f32 %v147_v18  ;;  %v437_v54 = vsel %vm435_vm9, %v420_v45, 0.0 }
 0x171   :  { %v150_v13 = vpop.xlane.xlu1 %149  ;;  %v897_v20 = vpop.xlane.xlu0 %173 }
 0x172   :  { %542 = vlog2.f32 %v150_v13 }
 0x174   :  { %v539_v5 = vpop.eup %538 }
 0x175   :  { %v188_v24 = vmul.f32 0.6931472, %v539_v5  ;;  %v153_v1 = vpop.xlane.xlu1 %152  ;;  %v177_v27 = vpop.xlane.xlu0 %176 }
 0x176   :  { %544 = vlog2.f32 %v153_v1 }
 0x177   :  { %546 = vlog2.f32 %v159_v51  ;;  %v350_v31 = vsub.f32 %v188_v24, %v304_v11  ;;  %v381_v51 = vsel %vm377_vm12, 1, %v619_v0 }
 0x178   :  { %v541_v41 = vpop.eup %540  ;;  %v394_v17 = vrot.slane %v381_v51, %v746_v7 }
 0x179   :  { %v192_v33 = vmul.f32 0.6931472, %v541_v41  ;;  %v156_v35 = vpop.xlane.xlu1 %155  ;;  %v180_v36 = vpop.xlane.xlu0 %179  ;;  %v419_v38 = vsel %vm399_vm7, %v350_v31, 0.0  ;;  %v382_v31 = vsel %vm378_vm14, 1, %v619_v0 }
 0x17a   :  { %548 = vlog2.f32 %v156_v35  ;;  %v436_v42 = vsel %vm435_vm9, %v419_v38, 0.0  ;;  %vm939_vm15 = vcmp.eq.s32.totalorder %v394_v17, 1  ;;  %v398_v0 = vrot.slane %v382_v31, %v746_v7 }
 0x17b   :  { %v352_v39 = vsub.f32 %v192_v33, %v310_v34  ;;  %v438_v60 = vadd.f32 %v437_v54, %v436_v42  ;;  %vm414_vm1 = vmand %vm374_vm8, %vm939_vm15 }
 0x17c   :  { %v543_v3 = vpop.eup %542  ;;  %vm951_vm0 = vcmp.eq.s32.totalorder %v398_v0, 1 }
 0x17d   :  { %v421_v37 = vsel %vm399_vm7, %v352_v39, 0.0  ;;  %v194_v46 = vmul.f32 0.6931472, %v543_v3  ;;  %v162_v48 = vpop.xlane.xlu1 %161  ;;  %v183_v52 = vpop.xlane.xlu0 %182  ;;  %vm418_vm2 = vmand %vm374_vm8, %vm951_vm0 }
 0x17e   :  { %550 = vlog2.f32 %v162_v48  ;;  %v439_v55 = vsel %vm435_vm9, %v421_v37, 0.0 }
 0x17f   :  { %552 = vlog2.f32 %v165_v4  ;;  %v353_v10 = vsub.f32 %v194_v46, %v313_v15  ;;  %v440_v59 = vadd.f32 %v439_v55, %v438_v60 }
 0x180   :  { %v545_v50 = vpop.eup %544  ;;  %554 = vlog2.f32 %v171_v19 }
 0x181   :  { %v547_v56 = vpop.eup %546  ;;  %v422_v2 = vsel %vm406_vm10, %v353_v10, 0.0  ;;  %v196_v14 = vmul.f32 0.6931472, %v545_v50  ;;  %v319_v57 = vpop.xlane.xlu1 %318  ;;  %556 = vlog2.f32 %v168_v16 }
 0x182   :  { %v441_v58 = vsel %vm435_vm9, %v422_v2, 0.0  ;;  %v186_v62 = vpop.xlane.xlu0 %185  ;;  %v200_v9 = vmul.f32 0.6931472, %v547_v56  ;;  %558 = vlog2.f32 %v177_v27 }
 0x183   :  { %v354_v47 = vsub.f32 %v196_v14, %v894_v30  ;;  %v442_v6 = vadd.f32 %v441_v58, %v440_v59  ;;  %560 = vlog2.f32 %v897_v20 }
 0x184   :  { %v549_v63 = vpop.eup %548  ;;  %562 = vlog2.f32 %v183_v52 }
 0x185   :  { %v198_v25 = vmul.f32 0.6931472, %v549_v63  ;;  %v423_v49 = vsel %vm914_vm11, %v354_v47, 0.0  ;;  %v322_v61 = vpop.xlane.xlu1 %321  ;;  %564 = vlog2.f32 %v180_v36 }
 0x186   :  { %v443_v8 = vsel %vm435_vm9, %v423_v49, 0.0  ;;  %v356_v11 = vsub.f32 %v200_v9, %v322_v61  ;;  %v334_v26 = vpop.xlane.xlu0 %333  ;;  %566 = vlog2.f32 %v186_v62 }
 0x187   :  { %v355_v34 = vsub.f32 %v198_v25, %v319_v57  ;;  %v444_v12 = vadd.f32 %v443_v8, %v442_v6 }
 0x188   :  { %v551_v15 = vpop.eup %550  ;;  %v425_v4 = vsel %vm914_vm11, %v356_v11, 0.0 }
 0x189   :  { %v553_v30 = vpop.eup %552  ;;  %v424_v43 = vsel %vm914_vm11, %v355_v34, 0.0  ;;  %v202_v16 = vmul.f32 0.6931472, %v551_v15  ;;  %v325_v18 = vpop.xlane.xlu1 %324  ;;  %v447_v5 = vsel %vm435_vm9, %v425_v4, 0.0 }
 0x18a   :  { %v445_v19 = vsel %vm435_vm9, %v424_v43, 0.0  ;;  %v555_v13 = vpop.eup %554  ;;  %v204_v23 = vmul.f32 0.6931472, %v553_v30  ;;  %v340_v38 = vpop.xlane.xlu0 %339 }
 0x18b   :  { %v446_v20 = vadd.f32 %v445_v19, %v444_v12  ;;  %v357_v29 = vsub.f32 %v202_v16, %v325_v18  ;;  %v557_v24 = vpop.eup %556  ;;  %v208_v41 = vmul.f32 0.6931472, %v555_v13 }
 0x18c   :  { %v559_v35 = vpop.eup %558  ;;  %v206_v3 = vmul.f32 0.6931472, %v557_v24 }
 0x18d   :  { %v448_v1 = vadd.f32 %v447_v5, %v446_v20  ;;  %v426_v27 = vsel %vm410_vm13, %v357_v29, 0.0  ;;  %v328_v28 = vpop.xlane.xlu1 %327  ;;  %v360_v39 = vsub.f32 %v208_v41, %v334_v26  ;;  %v561_v45 = vpop.eup %560  ;;  %v212_v48 = vmul.f32 0.6931472, %v559_v35 }
 0x18e   :  { %v449_v22 = vsel %vm435_vm9, %v426_v27, 0.0  ;;  %v358_v33 = vsub.f32 %v204_v23, %v328_v28  ;;  %v563_v53 = vpop.eup %562  ;;  %v210_v56 = vmul.f32 0.6931472, %v561_v45  ;;  %v346_v7 = vpop.xlane.xlu0 %345 }
 0x18f   :  { %v450_v36 = vadd.f32 %v449_v22, %v448_v1  ;;  %v565_v10 = vpop.eup %564  ;;  %v429_v50 = vsel %vm939_vm15, %v360_v39, 0.0  ;;  %v362_v54 = vsub.f32 %v212_v48, %v340_v38  ;;  %v216_v57 = vmul.f32 0.6931472, %v563_v53 }
 0x190   :  { %v427_v40 = vsel %vm939_vm15, %v358_v33, 0.0  ;;  %v455_v59 = vsel %vm435_vm9, %v429_v50, 0.0  ;;  %v214_v47 = vmul.f32 0.6931472, %v565_v10  ;;  %v567_v49 = vpop.eup %566 }
 0x191   :  { %v451_v37 = vsel %vm435_vm9, %v427_v40, 0.0  ;;  %v331_v46 = vpop.xlane.xlu1 %330  ;;  %v431_v62 = vsel %vm951_vm0, %v362_v54, 0.0  ;;  %v364_v63 = vsub.f32 %v216_v57, %v346_v7  ;;  %v218_v30 = vmul.f32 0.6931472, %v567_v49 }
 0x192   :  { %v452_v52 = vadd.f32 %v451_v37, %v450_v36  ;;  %v359_v42 = vsub.f32 %v206_v3, %v331_v46  ;;  %v459_v34 = vsel %vm435_vm9, %v431_v62, 0.0 }
 0x193   :  { %v433_v12 = vsel %vm951_vm0, %v364_v63, 0.0 }
 0x194   :  { %v428_v55 = vsel %vm939_vm15, %v359_v42, 0.0  ;;  %v463_v18 = vsel %vm435_vm9, %v433_v12, 0.0 }
 0x195   :  { %v453_v2 = vsel %vm435_vm9, %v428_v55, 0.0  ;;  %v337_v14 = vpop.xlane.xlu1 %336 }
 0x196   :  { %v454_v58 = vadd.f32 %v453_v2, %v452_v52  ;;  %v361_v21 = vsub.f32 %v210_v56, %v337_v14 }
 0x198   :  { %v430_v9 = vsel %vm414_vm1, %v361_v21, 0.0  ;;  %v456_v25 = vadd.f32 %v455_v59, %v454_v58 }
 0x199   :  { %v457_v6 = vsel %vm435_vm9, %v430_v9, 0.0  ;;  %v343_v61 = vpop.xlane.xlu1 %342 }
 0x19a   :  { %v458_v8 = vadd.f32 %v457_v6, %v456_v25  ;;  %v363_v11 = vsub.f32 %v214_v47, %v343_v61 }
 0x19c   :  { %v432_v15 = vsel %vm951_vm0, %v363_v11, 0.0  ;;  %v460_v51 = vadd.f32 %v459_v34, %v458_v8 }
 0x19d   :  { %v461_v43 = vsel %vm435_vm9, %v432_v15, 0.0  ;;  %v349_v4 = vpop.xlane.xlu1 %348 }
 0x19e   :  { %v462_v26 = vadd.f32 %v461_v43, %v460_v51  ;;  %v365_v16 = vsub.f32 %v218_v30, %v349_v4 }
 0x1a0   :  { %v434_v19 = vsel %vm418_vm2, %v365_v16, 0.0  ;;  %v464_v13 = vadd.f32 %v463_v18, %v462_v26 }
 0x1a1   :  { %v465_v20 = vsel %vm435_vm9, %v434_v19, 0.0 }
 0x1a2   :  { %v466_v17 = vadd.f32 %v465_v20, %v464_v13 }
 0x1a4   :  { %467 = vadd.xlane.f32.xlu0 %v466_v17 }
 0x231   :  { %v468_v29 = vpop.xlane.xlu0 %467 }
 0x232   :  { %v469_v5 = vrot.slane %v468_v29, 4 }
 0x234   :  { %v470_v23 = vadd.f32 %v469_v5, %v468_v29 }
 0x236   :  { %v471_v24 = vrot.slane %v470_v23, 2 }
 0x238   :  { %v472_v1 = vadd.f32 %v471_v24, %v470_v23 }
 0x23a   :  { %v473_v27 = vrot.slane %v472_v1, 1 }
 0x23c   :  { %v474_v28 = vadd.f32 %v473_v27, %v472_v1 }
 0x23e   :  { %494 = vpush %v474_v28 }
 0x26f   :  { %s495_s25 = spop %494 }
 0x270   :  { %v476_v32 = vstv %s495_s25 }
 0x271   :  { %477 = vst [vmem:[#allocation5] sm:$0xff] %v476_v32 }
 0x272   :  { %601 = shalt.err (!%p598_p12)
}
 0x273   :  { %s602_s29 = scalar_lea.hbm %s990_s2, 128 }
 0x274   :  { %p603_p13 = scmp.ne.s32.totalorder %s990_s2, %s602_s29  ;;  %p606_p0 = scmp.lt.u32.totalorder %s602_s29, %s990_s2 }
 0x276   :  { %p608_p1 = pnand %p606_p0, %p603_p13 }
 0x278   :  { %611 = shalt.err (!%p608_p1)
}
 0x279   :  { %487 = dma.vmem_to_hbm [thread:$0]  %s485_s24, 128, %s990_s2, [#allocation4]  }
 0x27a   :  { %614 = dma.done.wait [#allocation4], 128  }
 0x27b   :  { %615 = vsyncadd [#allocation4], 4294967168 }
 0x27c   :  { %491 = vsyncpa [#allocation3], 1 }
 0x27d   :  { %492 = vsyncpa [#allocation4], 1 }

</bundles_post_ra>
